<compile_context>
chip_gen: v6e
topology: v6e:2x2x1
jax: 0.10.0
libtpu: 0.0.40
codegen_flags: <defaults>
</compile_context>

<pallas_src>
import functools

import jax
import jax.numpy as jnp
from jax.experimental import pallas as pl
from jax.experimental.pallas import tpu as pltpu


def _round_up(n, m):
    return ((n + m - 1) // m) * m


def _mlp_kernel(x_ref, w1_ref, w2_ref, w3_ref, b_ref, o_ref, *, h1p, h2p, cp):
    # fc1 + bias + ReLU   (bf16 operands -> f32 accumulate on the MXU)
    h1 = jnp.dot(x_ref[...], w1_ref[...], preferred_element_type=jnp.float32)
    h1 = jnp.maximum(h1 + b_ref[:, 0:h1p], 0.0)

    # dropout(0.5) in eval/inference mode == identity

    # fc2 + bias + ReLU
    h2 = jnp.dot(h1.astype(jnp.bfloat16), w2_ref[...],
                 preferred_element_type=jnp.float32)
    h2 = jnp.maximum(h2 + b_ref[:, h1p:h1p + h2p], 0.0)

    # fc3 (logits, no activation)
    out = jnp.dot(h2.astype(jnp.bfloat16), w3_ref[...],
                  preferred_element_type=jnp.float32)
    o_ref[...] = out + b_ref[:, h1p + h2p:h1p + h2p + cp]


def neural_net_forward(x, params, *, tm=256):
    """Fused forward pass. x: (B, input_size) float32. Returns (B, num_classes) f32."""
    w1, b1, w2, b2, w3, b3 = params
    B, F = x.shape
    H1, H2, C = w1.shape[1], w2.shape[1], w3.shape[1]

    # Lane-dense padded dims (multiples of 128).
    Fp = _round_up(F, 128)
    H1p = _round_up(H1, 128)
    H2p = _round_up(H2, 128)
    Cp = _round_up(C, 128)

    # Batch tile: multiple of 8, capped at `tm`; pad batch so TM divides it.
    TM = min(tm, _round_up(B, 8))
    Bp = _round_up(B, TM)

    def pad2(a, rows, cols):
        return jnp.pad(a, ((0, rows - a.shape[0]), (0, cols - a.shape[1])))

    # bf16 operands for the MXU (zero padding keeps semantics exact:
    # padded hidden units get zero weight + zero bias -> ReLU(0) = 0).
    xp = pad2(x, Bp, Fp).astype(jnp.bfloat16)
    w1p = pad2(w1, Fp, H1p).astype(jnp.bfloat16)
    w2p = pad2(w2, H1p, H2p).astype(jnp.bfloat16)
    w3p = pad2(w3, H2p, Cp).astype(jnp.bfloat16)
    # Single fused bias operand (f32), one DMA instead of three.
    bcat = jnp.concatenate(
        [pad2(b1, 1, H1p), pad2(b2, 1, H2p), pad2(b3, 1, Cp)], axis=1
    ).astype(jnp.float32)

    kernel = functools.partial(_mlp_kernel, h1p=H1p, h2p=H2p, cp=Cp)

    out_padded = pl.pallas_call(
        kernel,
        out_shape=jax.ShapeDtypeStruct((Bp, Cp), jnp.float32),
        grid=(Bp // TM,),
        in_specs=[
            pl.BlockSpec((TM, Fp), lambda i: (i, 0)),          # x: walks batch
            pl.BlockSpec((Fp, H1p), lambda i: (0, 0)),         # weights resident
            pl.BlockSpec((H1p, H2p), lambda i: (0, 0)),
            pl.BlockSpec((H2p, Cp), lambda i: (0, 0)),
            pl.BlockSpec((1, H1p + H2p + Cp), lambda i: (0, 0)),
        ],
        out_specs=pl.BlockSpec((TM, Cp), lambda i: (i, 0)),
        compiler_params=pltpu.CompilerParams(
            dimension_semantics=("parallel",),
        ),
    )(xp, w1p, w2p, w3p, bcat)

    return out_padded[:B, :C]


def init_params(key, input_size, hidden_size_list, num_classes):
    """PyTorch-Linear-style init U(-1/sqrt(fan_in), 1/sqrt(fan_in)).
    Weights stored as (in_features, out_features), f32 master copies."""
    def linear(k, fan_in, fan_out):
        kw, kb = jax.random.split(k)
        bound = 1.0 / jnp.sqrt(fan_in)
        w = jax.random.uniform(kw, (fan_in, fan_out), jnp.float32, -bound, bound)
        b = jax.random.uniform(kb, (1, fan_out), jnp.float32, -bound, bound)
        return w, b

    k1, k2, k3 = jax.random.split(key, 3)
    w1, b1 = linear(k1, input_size, hidden_size_list[0])
    w2, b2 = linear(k2, hidden_size_list[0], hidden_size_list[1])
    w3, b3 = linear(k3, hidden_size_list[1], num_classes)
    return (w1, b1, w2, b2, w3, b3)


def _reference_forward(x, params):
    w1, b1, w2, b2, w3, b3 = params
    h1 = jnp.maximum(x @ w1 + b1, 0.0)
    h2 = jnp.maximum(h1 @ w2 + b2, 0.0)
    return h2 @ w3 + b3


if __name__ == "__main__":
    batch = 8
    input_size = 32
    hidden_size_list = [64, 48]
    num_classes = 10

    key = jax.random.PRNGKey(0)
    kx, kp = jax.random.split(key)
    x = jax.random.normal(kx, (batch, input_size), dtype=jnp.float32)
    params = init_params(kp, input_size, hidden_size_list, num_classes)

    # Small single-tile case.
    out = jax.block_until_ready(neural_net_forward(x, params))
    ref = _reference_forward(x, params)
    assert out.shape == (batch, num_classes)
    # bf16 MXU operands -> relaxed tolerance vs f32 reference.
    assert jnp.allclose(out, ref, atol=5e-2, rtol=5e-2)

    # Multi-tile case: exercises batch grid + padding/slicing (B=40, TM=16 -> 3 tiles).
    x2 = jax.random.normal(jax.random.PRNGKey(1), (40, input_size), dtype=jnp.float32)
    out2 = jax.block_until_ready(neural_net_forward(x2, params, tm=16))
    ref2 = _reference_forward(x2, params)
    assert out2.shape == (40, num_classes)
    assert jnp.allclose(out2, ref2, atol=5e-2, rtol=5e-2)

    print("KERNEL_OK")
</pallas_src>

<mosaic_0001>
module attributes {stable_mosaic.version = 11 : i64} {
  func.func @_mlp_kernel(%arg0: i32, %arg1: memref<8x128xbf16, #tpu.memory_space<vmem>>, %arg2: memref<128x128xbf16, #tpu.memory_space<vmem>>, %arg3: memref<128x128xbf16, #tpu.memory_space<vmem>>, %arg4: memref<128x128xbf16, #tpu.memory_space<vmem>>, %arg5: memref<1x384xf32, #tpu.memory_space<vmem>>, %arg6: memref<8x128xf32, #tpu.memory_space<vmem>>) attributes {dimension_semantics = [#tpu.dimension_semantics<parallel>], iteration_bounds = array<i64: 1>, scalar_prefetch = 0 : i64, scratch_operands = 0 : i64, tpu.core_type = #tpu.core_type<tc>, window_params = [{transform_indices = @transform_0, window_bounds = array<i64: 8, 128>}, {pipeline_mode = #tpu.pipeline_mode<synchronous>, transform_indices = @transform_1, window_bounds = array<i64: 128, 128>}, {pipeline_mode = #tpu.pipeline_mode<synchronous>, transform_indices = @transform_2, window_bounds = array<i64: 128, 128>}, {pipeline_mode = #tpu.pipeline_mode<synchronous>, transform_indices = @transform_3, window_bounds = array<i64: 128, 128>}, {pipeline_mode = #tpu.pipeline_mode<synchronous>, transform_indices = @transform_4, window_bounds = array<i64: 1, 384>}, {transform_indices = @transform_5, window_bounds = array<i64: 8, 128>}]} {
    %c0 = arith.constant 0 : index
    %c0_0 = arith.constant 0 : index
    %0 = vector.load %arg1[%c0, %c0_0] : memref<8x128xbf16, #tpu.memory_space<vmem>>, vector<8x128xbf16>
    %c0_1 = arith.constant 0 : index
    %c0_2 = arith.constant 0 : index
    %1 = vector.load %arg2[%c0_1, %c0_2] : memref<128x128xbf16, #tpu.memory_space<vmem>>, vector<128x128xbf16>
    %cst = arith.constant dense<0.000000e+00> : vector<8x128xf32>
    %2 = tpu.matmul %0, %1, %cst {dimension_numbers = #tpu.dot_dimension_numbers<[1], [0], [0], [1], [0, 0, 1, 1], [], []>} : vector<8x128xbf16>, vector<128x128xbf16>, vector<8x128xf32> -> vector<8x128xf32>
    %c0_3 = arith.constant 0 : index
    %c0_4 = arith.constant 0 : index
    %3 = vector.load %arg5[%c0_3, %c0_4] : memref<1x384xf32, #tpu.memory_space<vmem>>, vector<1x128xf32>
    %4 = vector.broadcast %3 : vector<1x128xf32> to vector<8x128xf32>
    %5 = arith.addf %2, %4 : vector<8x128xf32>
    %cst_5 = arith.constant 0.000000e+00 : f32
    %6 = vector.broadcast %cst_5 : f32 to vector<8x128xf32>
    %7 = arith.maximumf %5, %6 : vector<8x128xf32>
    %8 = arith.truncf %7 : vector<8x128xf32> to vector<8x128xbf16>
    %c0_6 = arith.constant 0 : index
    %c0_7 = arith.constant 0 : index
    %9 = vector.load %arg3[%c0_6, %c0_7] : memref<128x128xbf16, #tpu.memory_space<vmem>>, vector<128x128xbf16>
    %cst_8 = arith.constant dense<0.000000e+00> : vector<8x128xf32>
    %10 = tpu.matmul %8, %9, %cst_8 {dimension_numbers = #tpu.dot_dimension_numbers<[1], [0], [0], [1], [0, 0, 1, 1], [], []>} : vector<8x128xbf16>, vector<128x128xbf16>, vector<8x128xf32> -> vector<8x128xf32>
    %c0_9 = arith.constant 0 : index
    %c128 = arith.constant 128 : index
    %11 = vector.load %arg5[%c0_9, %c128] : memref<1x384xf32, #tpu.memory_space<vmem>>, vector<1x128xf32>
    %12 = vector.broadcast %11 : vector<1x128xf32> to vector<8x128xf32>
    %13 = arith.addf %10, %12 : vector<8x128xf32>
    %cst_10 = arith.constant 0.000000e+00 : f32
    %14 = vector.broadcast %cst_10 : f32 to vector<8x128xf32>
    %15 = arith.maximumf %13, %14 : vector<8x128xf32>
    %16 = arith.truncf %15 : vector<8x128xf32> to vector<8x128xbf16>
    %c0_11 = arith.constant 0 : index
    %c0_12 = arith.constant 0 : index
    %17 = vector.load %arg4[%c0_11, %c0_12] : memref<128x128xbf16, #tpu.memory_space<vmem>>, vector<128x128xbf16>
    %cst_13 = arith.constant dense<0.000000e+00> : vector<8x128xf32>
    %18 = tpu.matmul %16, %17, %cst_13 {dimension_numbers = #tpu.dot_dimension_numbers<[1], [0], [0], [1], [0, 0, 1, 1], [], []>} : vector<8x128xbf16>, vector<128x128xbf16>, vector<8x128xf32> -> vector<8x128xf32>
    %c0_14 = arith.constant 0 : index
    %c256 = arith.constant 256 : index
    %19 = vector.load %arg5[%c0_14, %c256] : memref<1x384xf32, #tpu.memory_space<vmem>>, vector<1x128xf32>
    %20 = vector.broadcast %19 : vector<1x128xf32> to vector<8x128xf32>
    %21 = arith.addf %18, %20 : vector<8x128xf32>
    %c0_15 = arith.constant 0 : index
    %c0_16 = arith.constant 0 : index
    %22 = vector.load %arg6[%c0_15, %c0_16] : memref<8x128xf32, #tpu.memory_space<vmem>>, vector<8x128xf32>
    tpu.vector_store %arg6[%c0_15, %c0_16], %21 {strides = array<i32>} : memref<8x128xf32, #tpu.memory_space<vmem>>, vector<8x128xf32>,
    return
  }
  func.func @transform_0(%arg0: i32) -> (i32, i32) {
    %c0_i32 = arith.constant 0 : i32
    %c0_i32_0 = arith.constant 0 : i32
    return %arg0, %c0_i32 : i32, i32
  }
  func.func @transform_1(%arg0: i32) -> (i32, i32) {
    %c0_i32 = arith.constant 0 : i32
    %c0_i32_0 = arith.constant 0 : i32
    %c0_i32_1 = arith.constant 0 : i32
    return %c0_i32, %c0_i32_0 : i32, i32
  }
  func.func @transform_2(%arg0: i32) -> (i32, i32) {
    %c0_i32 = arith.constant 0 : i32
    %c0_i32_0 = arith.constant 0 : i32
    %c0_i32_1 = arith.constant 0 : i32
    return %c0_i32, %c0_i32_0 : i32, i32
  }
  func.func @transform_3(%arg0: i32) -> (i32, i32) {
    %c0_i32 = arith.constant 0 : i32
    %c0_i32_0 = arith.constant 0 : i32
    %c0_i32_1 = arith.constant 0 : i32
    return %c0_i32, %c0_i32_0 : i32, i32
  }
  func.func @transform_4(%arg0: i32) -> (i32, i32) {
    %c0_i32 = arith.constant 0 : i32
    %c0_i32_0 = arith.constant 0 : i32
    %c0_i32_1 = arith.constant 0 : i32
    return %c0_i32, %c0_i32_0 : i32, i32
  }
  func.func @transform_5(%arg0: i32) -> (i32, i32) {
    %c0_i32 = arith.constant 0 : i32
    %c0_i32_0 = arith.constant 0 : i32
    return %arg0, %c0_i32 : i32, i32
  }
}

</mosaic_0001>

<bundles_post_ra>
// kernel: tpu_custom_call.1
= control target key start
LH: loop header
LB: loop body
LE: loop exit
PB: predicated region body
PF: predicated region fallthrough
CT: control target
= control target key end

     0   :  { %10 = vsyncpa [#allocation3], 0  ;;  %s788_s0 = inlined_call_operand.hbm [shape: bf16[8,128], index: 0, kind: input, shape index: {}]   ;;  %s789_s1 = inlined_call_operand.hbm [shape: bf16[128,128], index: 1, kind: input, shape index: {}]   ;;  %s790_s2 = inlined_call_operand.hbm [shape: bf16[128,128], index: 2, kind: input, shape index: {}]   ;;  %s791_s3 = inlined_call_operand.hbm [shape: bf16[128,128], index: 3, kind: input, shape index: {}]   ;;  %s792_s4 = inlined_call_operand.vmem [shape: f32[1,384], index: 4, kind: input, shape index: {}]   ;;  %s793_s5 = inlined_call_operand.hbm [shape: f32[8,128], index: 5, kind: output, shape index: {}]  }
   0x1   :  { %11 = vsyncpa [#allocation6], 0 }
   0x2   :  { %12 = vsyncpa [#allocation9], 0 }
   0x3   :  { %13 = vsyncpa [#allocation4], 0  ;;  %s686_s18 = smov [#allocation5]  }
   0x4   :  { %s29_s19 = sshll.u32 %s686_s18, 4  ;;  %s30_s19 = int_to_ptr.vmem [resolvable:$true] %s29_s19 }
   0x5   :  { %s586_s20 = scalar_lea.vmem %s30_s19, 1024  ;;  %p591_p1 = scmp.lt.s32.totalorder %s30_s19, %s30_s19 }
   0x6   :  { %p587_p0 = scmp.ne.s32.totalorder %s30_s19, %s586_s20  ;;  %p592_p2 = scmp.lt.s32.totalorder %s586_s20, %s586_s20 }
   0x8   :  { %p593_p3 = por %p592_p2, %p591_p1 }
   0xa   :  { %p594_p4 = pnand %p593_p3, %p587_p0 }
   0xc   :  { %597 = shalt.err (!%p594_p4)
}
   0xd   :  { %s687_s21 = smov 64   ;;  %s688_s22 = smov 4  }
   0xe   :  { %35 = dma.hbm_to_vmem [thread:$0]  %s789_s1, 1024, %s30_s19, [#allocation6], %s687_s21, %s687_s21, %s688_s22  }
   0xf   :  { %s689_s25 = smov [#allocation2]   ;;  %s690_s27 = smov [#allocation7]  }
  0x10   :  { %s20_s26 = sshll.u32 %s689_s25, 4  ;;  %s41_s28 = sshll.u32 %s690_s27, 4  ;;  %s21_s26 = int_to_ptr.vmem [resolvable:$true] %s20_s26  ;;  %s42_s28 = int_to_ptr.vmem [resolvable:$true] %s41_s28 }
  0x11   :  { %s606_s29 = scalar_lea.vmem %s21_s26, 64  ;;  %p611_p6 = scmp.lt.s32.totalorder %s21_s26, %s21_s26 }
  0x12   :  { %p607_p5 = scmp.ne.s32.totalorder %s21_s26, %s606_s29  ;;  %p612_p7 = scmp.lt.s32.totalorder %s606_s29, %s606_s29 }
  0x14   :  { %p613_p8 = por %p612_p7, %p611_p6 }
  0x16   :  { %p614_p9 = pnand %p613_p8, %p607_p5 }
  0x18   :  { %617 = shalt.err (!%p614_p9)
}
  0x19   :  { %23 = dma.hbm_to_vmem [thread:$0]  %s788_s0, 64, %s21_s26, [#allocation3]  }
  0x1a   :  { %s626_s7 = scalar_lea.vmem %s42_s28, 1024  ;;  %p631_p11 = scmp.lt.s32.totalorder %s42_s28, %s42_s28 }
  0x1b   :  { %p627_p10 = scmp.ne.s32.totalorder %s42_s28, %s626_s7  ;;  %p632_p12 = scmp.lt.s32.totalorder %s626_s7, %s626_s7 }
  0x1d   :  { %p633_p13 = por %p632_p12, %p631_p11 }
  0x1f   :  { %p634_p0 = pnand %p633_p13, %p627_p10 }
  0x21   :  { %637 = shalt.err (!%p634_p0)
}
  0x22   :  { %47 = dma.hbm_to_vmem [thread:$0]  %s790_s2, 1024, %s42_s28, [#allocation6], %s687_s21, %s687_s21, %s688_s22  }
  0x23   :  { %s691_s9 = smov [#allocation8]  }
  0x24   :  { %s53_s10 = sshll.u32 %s691_s9, 4  ;;  %s54_s10 = int_to_ptr.vmem [resolvable:$true] %s53_s10 }
  0x25   :  { %s646_s11 = scalar_lea.vmem %s54_s10, 1024  ;;  %p651_p2 = scmp.lt.s32.totalorder %s54_s10, %s54_s10 }
  0x26   :  { %p647_p1 = scmp.ne.s32.totalorder %s54_s10, %s646_s11  ;;  %p652_p3 = scmp.lt.s32.totalorder %s646_s11, %s646_s11 }
  0x28   :  { %p653_p4 = por %p652_p3, %p651_p2 }
  0x2a   :  { %p654_p5 = pnand %p653_p4, %p647_p1 }
  0x2c   :  { %657 = shalt.err (!%p654_p5)
}
  0x2d   :  { %59 = dma.hbm_to_vmem [thread:$0]  %s791_s3, 1024, %s54_s10, [#allocation9], %s687_s21, %s687_s21, %s688_s22  }
  0x2e   :  { %678 = dma.done.wait [#allocation3], 64  }
  0x2f   :  { %679 = vsyncadd [#allocation3], 4294967232 }
  0x30   :  { %680 = dma.done.wait [#allocation6], 2048  }
  0x31   :  { %681 = vsyncadd [#allocation6], 4294965248 }
  0x32   :  { %682 = dma.done.wait [#allocation9], 1024  }
  0x33   :  { %683 = vsyncadd [#allocation9], 4294966272  ;;  %v692_v0 = vmov 0.0   ;;  %vm693_vm0 = vmmov 0   ;;  %v554_v1 = vld [vmem:[#allocation5 + $0x38] sm:$0xff]   ;;  %v555_v2 = vld [vmem:[#allocation5 + $0x30] sm:$0xff]  }
  0x34   :  { %485 = vmatprep.subr.bf16.mxu0 %v692_v0  ;;  %501 = vmatprep.mubr.msk.bf16.mxu0 %vm693_vm0, %v692_v0  ;;  %v556_v3 = vld [vmem:[#allocation5 + $0x28] sm:$0xff]   ;;  %v562_v4 = vld [vmem:[#allocation7 + $0x38] sm:$0xff]   ;;  %v557_v5 = vld [vmem:[#allocation5 + $0x20] sm:$0xff]   ;;  %s694_s17 = smov [#allocation10]  }
  0x35   :  { %505 = vmatprep.subr.bf16.mxu1 %v692_v0  ;;  %521 = vmatprep.mubr.msk.bf16.mxu1 %vm693_vm0, %v692_v0  ;;  %v563_v6 = vld [vmem:[#allocation7 + $0x30] sm:$0xff]   ;;  %v558_v7 = vld [vmem:[#allocation5 + $0x18] sm:$0xff]   ;;  %v564_v8 = vld [vmem:[#allocation7 + $0x28] sm:$0xff]   ;;  %s420_s18 = sshll.u32 %s694_s17, 4  ;;  %s421_s18 = int_to_ptr.vmem [resolvable:$true] %s420_s18 }
  0x36   :  { %486 = vmatpush3.bf16.msra.mxu0 %v554_v1  ;;  %506 = vmatpush3.bf16.msra.mxu1 %v562_v4  ;;  %v559_v9 = vld [vmem:[#allocation5 + $0x10] sm:$0xff]   ;;  %v565_v10 = vld [vmem:[#allocation7 + $0x20] sm:$0xff]   ;;  %v560_v11 = vld [vmem:[#allocation5 + $0x8] sm:$0xff]   ;;  %s658_s19 = scalar_lea.vmem %s421_s18, 128  ;;  %p663_p7 = scmp.lt.s32.totalorder %s421_s18, %s421_s18 }
  0x37   :  { %487 = vmatprep.subr.bf16.mxu0 %v692_v0  ;;  %507 = vmatprep.subr.bf16.mxu1 %v692_v0  ;;  %v566_v12 = vld [vmem:[#allocation7 + $0x18] sm:$0xff]   ;;  %v561_v13 = vld [vmem:[#allocation5] sm:$0xff]   ;;  %v567_v14 = vld [vmem:[#allocation7 + $0x10] sm:$0xff]   ;;  %p659_p6 = scmp.ne.s32.totalorder %s421_s18, %s658_s19  ;;  %p664_p8 = scmp.lt.s32.totalorder %s658_s19, %s658_s19 }
  0x38   :  { %v75_v15 = vld [vmem:[#allocation2] sm:$0xf]  ;;  %v568_v16 = vld [vmem:[#allocation7 + $0x8] sm:$0xff]   ;;  %v569_v17 = vld [vmem:[#allocation7] sm:$0xff]  }
  0x39   :  { %v570_v18 = vld [vmem:[#allocation8 + $0x38] sm:$0xff]   ;;  %v571_v19 = vld [vmem:[#allocation8 + $0x30] sm:$0xff]   ;;  %v572_v20 = vld [vmem:[#allocation8 + $0x28] sm:$0xff]   ;;  %p665_p9 = por %p664_p8, %p663_p7 }
  0x3a   :  { %488 = vmatpush3.bf16.msra.mxu0 %v555_v2  ;;  %508 = vmatpush3.bf16.msra.mxu1 %v563_v6  ;;  %v573_v21 = vld [vmem:[#allocation8 + $0x20] sm:$0xff]   ;;  %v574_v22 = vld [vmem:[#allocation8 + $0x18] sm:$0xff]   ;;  %v575_v23 = vld [vmem:[#allocation8 + $0x10] sm:$0xff]  }
  0x3b   :  { %489 = vmatprep.subr.bf16.mxu0 %v692_v0  ;;  %509 = vmatprep.subr.bf16.mxu1 %v692_v0  ;;  %v431_v24 = vld [vmem:[%s792_s4] ss:$0 sm:$0xff]  ;;  %v576_v32 = vld [vmem:[#allocation8 + $0x8] sm:$0xff]   ;;  %v577_v33 = vld [vmem:[#allocation8] sm:$0xff]   ;;  %p666_p10 = pnand %p665_p9, %p659_p6 }
  0x3c   :  { %v440_v34 = vld [vmem:[%s792_s4 + $0x1] ss:$0 sm:$0xff]  ;;  %v449_v42 = vld [vmem:[%s792_s4 + $0x2] ss:$0 sm:$0xff] }
  0x3e   :  { %490 = vmatpush3.bf16.msra.mxu0 %v556_v3  ;;  %510 = vmatpush3.bf16.msra.mxu1 %v564_v8 }
  0x3f   :  { %491 = vmatprep.subr.bf16.mxu0 %v692_v0  ;;  %511 = vmatprep.subr.bf16.mxu1 %v692_v0 }
  0x42   :  { %492 = vmatpush3.bf16.msra.mxu0 %v557_v5  ;;  %512 = vmatpush3.bf16.msra.mxu1 %v565_v10 }
  0x43   :  { %493 = vmatprep.subr.bf16.mxu0 %v692_v0  ;;  %513 = vmatprep.subr.bf16.mxu1 %v692_v0 }
  0x46   :  { %494 = vmatpush3.bf16.msra.mxu0 %v558_v7  ;;  %514 = vmatpush3.bf16.msra.mxu1 %v566_v12 }
  0x47   :  { %495 = vmatprep.subr.bf16.mxu0 %v692_v0  ;;  %515 = vmatprep.subr.bf16.mxu1 %v692_v0 }
  0x4a   :  { %496 = vmatpush3.bf16.msra.mxu0 %v559_v9  ;;  %516 = vmatpush3.bf16.msra.mxu1 %v567_v14 }
  0x4b   :  { %497 = vmatprep.subr.bf16.mxu0 %v692_v0  ;;  %517 = vmatprep.subr.bf16.mxu1 %v692_v0 }
  0x4e   :  { %498 = vmatpush3.bf16.msra.mxu0 %v560_v11  ;;  %518 = vmatpush3.bf16.msra.mxu1 %v568_v16 }
  0x4f   :  { %499 = vmatprep.subr.bf16.mxu0 %v692_v0  ;;  %519 = vmatprep.subr.bf16.mxu1 %v692_v0 }
  0x52   :  { %500 = vmatpush3.bf16.msra.mxu0 %v561_v13  ;;  %520 = vmatpush3.bf16.msra.mxu1 %v569_v17 }
  0x53   :  { %525 = vmatprep.subr.bf16.mxu0 %v692_v0 }
  0x55   :  { %502 = vmatmul.mubr.bf16.vlgmr.msra.gmra.mxu0 %v75_v15 }
  0x56   :  { %541 = vmatprep.mubr.msk.bf16.mxu0 %vm693_vm0, %v692_v0  ;;  %526 = vmatpush3.bf16.msra.mxu0 %v570_v18 }
  0x57   :  { %527 = vmatprep.subr.bf16.mxu0 %v692_v0 }
  0x5a   :  { %528 = vmatpush3.bf16.msra.mxu0 %v571_v19 }
  0x5b   :  { %529 = vmatprep.subr.bf16.mxu0 %v692_v0 }
  0x5e   :  { %530 = vmatpush3.bf16.msra.mxu0 %v572_v20 }
  0x5f   :  { %531 = vmatprep.subr.bf16.mxu0 %v692_v0 }
  0x62   :  { %532 = vmatpush3.bf16.msra.mxu0 %v573_v21 }
  0x63   :  { %533 = vmatprep.subr.bf16.mxu0 %v692_v0 }
  0x66   :  { %534 = vmatpush3.bf16.msra.mxu0 %v574_v22 }
  0x67   :  { %535 = vmatprep.subr.bf16.mxu0 %v692_v0 }
  0x6a   :  { %536 = vmatpush3.bf16.msra.mxu0 %v575_v23 }
  0x6b   :  { %537 = vmatprep.subr.bf16.mxu0 %v692_v0 }
  0x6e   :  { %538 = vmatpush3.bf16.msra.mxu0 %v576_v32 }
  0x6f   :  { %539 = vmatprep.subr.bf16.mxu0 %v692_v0 }
  0x72   :  { %540 = vmatpush3.bf16.msra.mxu0 %v577_v33 }
 0x115   :  { %v181_v25 = vpop.f32.mrf.mxu0 }
 0x116   :  { %v182_v26 = vadd.f32 %v431_v24, %v181_v25 }
 0x117   :  { %v503_v27 = vpop.f32.mrf.mxu0 }
 0x118   :  { %v187_v28 = vmax.f32 %v182_v26, 0.0 }
 0x119   :  { %v184_v29 = vpop.f32.mrf.mxu0 }
 0x11a   :  { %v188_v30 = vpack.c.bf16 %v187_v28, %v187_v28 }
 0x11b   :  { %v504_v31 = vpop.f32.mrf.mxu0 }
 0x11c   :  { %522 = vmatmul.mubr.bf16.vlgmr.msra.gmra.mxu1 %v188_v30 }
 0x1dc   :  { %v294_v35 = vpop.f32.mrf.mxu1 }
 0x1dd   :  { %v295_v36 = vadd.f32 %v440_v34, %v294_v35 }
 0x1de   :  { %v523_v37 = vpop.f32.mrf.mxu1 }
 0x1df   :  { %v300_v38 = vmax.f32 %v295_v36, 0.0 }
 0x1e0   :  { %v297_v39 = vpop.f32.mrf.mxu1 }
 0x1e1   :  { %v301_v40 = vpack.c.bf16 %v300_v38, %v300_v38 }
 0x1e2   :  { %v524_v41 = vpop.f32.mrf.mxu1 }
 0x1e3   :  { %542 = vmatmul.mubr.bf16.vlgmr.msra.gmra.mxu0 %v301_v40 }
 0x2a3   :  { %v407_v43 = vpop.f32.mrf.mxu0 }
 0x2a4   :  { %v408_v44 = vadd.f32 %v449_v42, %v407_v43 }
 0x2a5   :  { %v543_v45 = vpop.f32.mrf.mxu0 }
 0x2a6   :  { %413 = vst [vmem:[#allocation10] sm:$0xff] %v408_v44 }
 0x2a7   :  { %v410_v46 = vpop.f32.mrf.mxu0 }
 0x2a8   :  { %669 = shalt.err (!%p666_p10)
}
 0x2a9   :  { %423 = dma.vmem_to_hbm [thread:$0]  %s421_s18, 128, %s793_s5, [#allocation4]   ;;  %v544_v47 = vpop.f32.mrf.mxu0 }
 0x2aa   :  { %684 = dma.done.wait [#allocation4], 128  }
 0x2ab   :  { %685 = vsyncadd [#allocation4], 4294967168 }
 0x2ac   :  { %427 = vsyncpa [#allocation3], 1 }
 0x2ad   :  { %428 = vsyncpa [#allocation6], 1 }
 0x2ae   :  { %429 = vsyncpa [#allocation9], 1 }
 0x2af   :  { %430 = vsyncpa [#allocation4], 1 }

</bundles_post_ra>
